<compile_context>
chip_gen: v6e
topology: v6e:2x2x1
jax: 0.10.0
libtpu: 0.0.40
codegen_flags: <defaults>
</compile_context>

<pallas_src>
import functools

import jax
import jax.numpy as jnp
from jax.experimental import pallas as pl
from jax.experimental.pallas import tpu as pltpu


def _repeat_encoder_kernel(x_ref, o_ref, *, n: int):
    # Affine transform once on the (rows, F) input tile, then lay out the n
    # repeated copies contiguously along the lane axis as one wide store.
    t = x_ref[...] * 2 - 1
    o_ref[...] = jnp.tile(t, (1, n)).astype(o_ref.dtype)


def repeat_encoder(
    x: jax.Array,
    n: int,
    *,
    row_tile: int | None = None,
    force_pallas: bool = False,
) -> jax.Array:
    """Pallas equivalent of RepeatEncoder(n).forward(x) for 2-D x of shape (B, F)."""
    B, F = x.shape
    itemsize = jnp.dtype(x.dtype).itemsize

    # Tiny-shape dispatch: launch + per-step overhead would dominate a few-KiB
    # problem, and XLA fuses this into a single kernel anyway.
    if not force_pallas and B * F * n < (1 << 16):
        return (jnp.tile(x, (1, n)) * 2 - 1).astype(x.dtype)

    # Sublane packing for the second-to-last block dim: 8 (f32) / 16 (bf16) / 32 (i8).
    pack = 32 // itemsize

    # Budget for the double-buffered input + output tiles (kept well under the
    # 32 MiB default scoped VMEM on v6e/v7x, with headroom below v7x's 64 MiB).
    tile_budget_bytes = 24 * 1024 * 1024
    per_row_bytes = 2 * F * (1 + n) * itemsize  # 2x = double buffering

    if per_row_bytes * pack > 40 * 1024 * 1024:
        # TODO(synk): tile the repeat axis into lane-dense groups for extremely
        # wide F*n outputs; fall back to fused XLA for now.
        return (jnp.tile(x, (1, n)) * 2 - 1).astype(x.dtype)

    if row_tile is None:
        tb = (tile_budget_bytes // per_row_bytes) // pack * pack
        tb = max(pack, min(tb, 1024))
    else:
        tb = row_tile
    if tb >= B:
        tb = B  # full-dim block is always legal, even if B is not a multiple of pack

    grid = (pl.cdiv(B, tb),)

    cost = pl.CostEstimate(
        flops=2 * B * F * n,
        transcendentals=0,
        bytes_accessed=B * F * itemsize * (1 + n),
    )

    return pl.pallas_call(
        functools.partial(_repeat_encoder_kernel, n=n),
        out_shape=jax.ShapeDtypeStruct((B, F * n), x.dtype),
        grid=grid,
        # Input: i-th row tile, full feature width (read once per row tile).
        in_specs=[pl.BlockSpec((tb, F), lambda i: (i, 0))],
        # Output: i-th row tile, all n repeats as one lane-dense slab.
        out_specs=pl.BlockSpec((tb, F * n), lambda i: (i, 0)),
        compiler_params=pltpu.CompilerParams(
            dimension_semantics=("parallel",),
            vmem_limit_bytes=48 * 1024 * 1024,
        ),
        cost_estimate=cost,
    )(x)


if __name__ == "__main__":
    key = jax.random.PRNGKey(0)

    # Case 1: module-scale shapes (B=2, F=128, n=4); force the Pallas path.
    B, F, n = 2, 128, 4
    x = jax.random.normal(key, (B, F), dtype=jnp.float32)
    out = jax.block_until_ready(repeat_encoder(x, n, force_pallas=True))
    ref = 2.0 * jnp.tile(x, (1, n)) - 1.0
    assert out.shape == (B, F * n), out.shape
    assert out.dtype == x.dtype, out.dtype
    assert jnp.allclose(out, ref, atol=1e-6, rtol=1e-6), "mismatch vs reference (case 1)"

    # Case 2: row-tiled path with a partial last row tile and non-128-aligned F.
    B2, F2, n2 = 260, 96, 5
    x2 = jax.random.normal(jax.random.PRNGKey(0), (B2, F2), dtype=jnp.float32)
    out2 = jax.block_until_ready(repeat_encoder(x2, n2, row_tile=64, force_pallas=True))
    ref2 = 2.0 * jnp.tile(x2, (1, n2)) - 1.0
    assert out2.shape == (B2, F2 * n2), out2.shape
    assert jnp.allclose(out2, ref2, atol=1e-6, rtol=1e-6), "mismatch vs reference (case 2)"

    # Case 3: tiny-shape dispatch (pure-JAX fast path) matches too.
    out3 = jax.block_until_ready(repeat_encoder(x, n))
    assert jnp.allclose(out3, ref, atol=1e-6, rtol=1e-6), "mismatch vs reference (case 3)"

    print("KERNEL_OK")
</pallas_src>

<mosaic_0001>
module attributes {stable_mosaic.version = 11 : i64} {
  func.func @_repeat_encoder_kernel(%arg0: i32, %arg1: memref<2x128xf32, #tpu.memory_space<vmem>>, %arg2: memref<2x512xf32, #tpu.memory_space<vmem>>) attributes {dimension_semantics = [#tpu.dimension_semantics<parallel>], iteration_bounds = array<i64: 1>, scalar_prefetch = 0 : i64, scratch_operands = 0 : i64, tpu.core_type = #tpu.core_type<tc>, window_params = [{transform_indices = @transform_0, window_bounds = array<i64: 2, 128>}, {transform_indices = @transform_1, window_bounds = array<i64: 2, 512>}]} {
    %c0 = arith.constant 0 : index
    %c0_0 = arith.constant 0 : index
    %0 = vector.load %arg1[%c0, %c0_0] : memref<2x128xf32, #tpu.memory_space<vmem>>, vector<2x128xf32>
    %cst = arith.constant 2.000000e+00 : f32
    %1 = vector.broadcast %cst : f32 to vector<2x128xf32>
    %2 = arith.mulf %0, %1 : vector<2x128xf32>
    %cst_1 = arith.constant 1.000000e+00 : f32
    %3 = vector.broadcast %cst_1 : f32 to vector<2x128xf32>
    %4 = arith.subf %2, %3 : vector<2x128xf32>
    %5 = tpu.concatenate %4, %4, %4, %4 in 1 : vector<2x128xf32>, vector<2x128xf32>, vector<2x128xf32>, vector<2x128xf32> -> vector<2x512xf32>
    %c0_2 = arith.constant 0 : index
    %c0_3 = arith.constant 0 : index
    %6 = vector.load %arg2[%c0_2, %c0_3] : memref<2x512xf32, #tpu.memory_space<vmem>>, vector<2x512xf32>
    tpu.vector_store %arg2[%c0_2, %c0_3], %5 {strides = array<i32>} : memref<2x512xf32, #tpu.memory_space<vmem>>, vector<2x512xf32>,
    return
  }
  func.func @transform_0(%arg0: i32) -> (i32, i32) {
    %c0_i32 = arith.constant 0 : i32
    %c0_i32_0 = arith.constant 0 : i32
    return %arg0, %c0_i32 : i32, i32
  }
  func.func @transform_1(%arg0: i32) -> (i32, i32) {
    %c0_i32 = arith.constant 0 : i32
    %c0_i32_0 = arith.constant 0 : i32
    return %arg0, %c0_i32 : i32, i32
  }
}

</mosaic_0001>

<bundles_post_ra>
// kernel: tpu_custom_call.1
= control target key start
LH: loop header
LB: loop body
LE: loop exit
PB: predicated region body
PF: predicated region fallthrough
CT: control target
= control target key end

     0   :  { %6 = vsyncpa [#allocation3], 0  ;;  %s118_s0 = inlined_call_operand.hbm [shape: f32[2,128], index: 0, kind: input, shape index: {}]   ;;  %s119_s1 = inlined_call_operand.hbm [shape: f32[2,512], index: 1, kind: output, shape index: {}]  }
   0x1   :  { %7 = vsyncpa [#allocation4], 0  ;;  %s99_s6 = smov [#allocation2]  }
   0x2   :  { %s14_s7 = sshll.u32 %s99_s6, 4  ;;  %s15_s7 = int_to_ptr.vmem [resolvable:$true] %s14_s7 }
   0x3   :  { %s63_s8 = scalar_lea.vmem %s15_s7, 32  ;;  %p68_p1 = scmp.lt.s32.totalorder %s15_s7, %s15_s7 }
   0x4   :  { %p64_p0 = scmp.ne.s32.totalorder %s15_s7, %s63_s8  ;;  %p69_p2 = scmp.lt.s32.totalorder %s63_s8, %s63_s8 }
   0x6   :  { %p70_p3 = por %p69_p2, %p68_p1 }
   0x8   :  { %p71_p4 = pnand %p70_p3, %p64_p0 }
   0xa   :  { %74 = shalt.err (!%p71_p4)
}
   0xb   :  { %17 = dma.hbm_to_vmem [thread:$0]  %s118_s0, 32, %s15_s7, [#allocation3]  }
   0xc   :  { %95 = dma.done.wait [#allocation3], 32  }
   0xd   :  { %96 = vsyncadd [#allocation3], 4294967264  ;;  %v100_v0 = vmov 1983009808   ;;  %v29_v2 = vlaneseq  ;;  %v21_v5 = vld [vmem:[#allocation2] sm:$0x3] }
   0xe   :  { %v27_v1 = vunpack.c.l.s4 %v100_v0  ;;  %v22_v6 = vmul.f32 2.0, %v21_v5  ;;  %s101_s11 = smov [#allocation5]  }
   0xf   :  { %v30_v4 = vshrl.u32 %v29_v2, 7  ;;  %s42_s12 = sshll.u32 %s101_s11, 4  ;;  %s43_s12 = int_to_ptr.vmem [resolvable:$true] %s42_s12 }
  0x10   :  { %v28_v3 = vunpack.c.0.s8 %v27_v1  ;;  %v51_v7 = vadd.f32 -1.0, %v22_v6  ;;  %s75_s13 = scalar_lea.vmem %s43_s12, 128  ;;  %p80_p6 = scmp.lt.s32.totalorder %s43_s12, %s43_s12 }
  0x11   :  { %p76_p5 = scmp.ne.s32.totalorder %s43_s12, %s75_s13  ;;  %p81_p7 = scmp.lt.s32.totalorder %s75_s13, %s75_s13 }
  0x12   :  { %v31_v8 = vsub.s32 %v28_v3, %v30_v4  ;;  %v25_v9 = vcombine.low %v51_v7, %v51_v7 }
  0x13   :  { %p82_p8 = por %p81_p7, %p80_p6 }
  0x14   :  { %v32_v10 = vrot.slane %v25_v9, %v31_v8 }
  0x15   :  { %p83_p9 = pnand %p82_p8, %p76_p5 }
  0x16   :  { %v33_v11 = vcombine.low %v32_v10, %v32_v10 }
  0x18   :  { %35 = vst [vmem:[#allocation5] sm:$0xff] %v33_v11 }
  0x19   :  { %86 = shalt.err (!%p83_p9)
}
  0x1a   :  { %45 = dma.vmem_to_hbm [thread:$0]  %s43_s12, 128, %s119_s1, [#allocation4]  }
  0x1b   :  { %97 = dma.done.wait [#allocation4], 128  }
  0x1c   :  { %98 = vsyncadd [#allocation4], 4294967168 }
  0x1d   :  { %49 = vsyncpa [#allocation3], 1 }
  0x1e   :  { %50 = vsyncpa [#allocation4], 1 }

</bundles_post_ra>
